<compile_context>
chip_gen: v5e
topology: v5e:2x2
jax: 0.10.0
libtpu: 0.0.40
codegen_flags: <defaults>
</compile_context>

<pallas_src>
import jax
import jax.numpy as jnp
from jax import lax
from jax.experimental import pallas as pl
from jax.experimental.pallas import tpu as pltpu


def _pick_heads_per_block(bh: int, cap: int = 8) -> int:
    """Largest divisor of bh <= cap; prefer leaving >=2 grid steps for megacore."""
    cap = min(cap, bh)
    if bh >= 4:
        cap = min(cap, bh // 2)
    for hb in range(cap, 0, -1):
        if bh % hb == 0:
            return hb
    return 1


def _pick_q_tile(lq: int, cap: int = 256) -> int:
    """Largest divisor of lq that is <= cap and a multiple of 8 (or lq itself)."""
    if lq <= cap:
        return lq
    start = cap - (cap % 8)
    for t in range(start, 7, -8):
        if lq % t == 0:
            return t
    return lq  # block == full dim is always a legal block shape


def _make_sdpa_kernel(inv_temperature: float, with_mask: bool, return_attn: bool):
    def kernel(*refs):
        if with_mask:
            q_ref, k_ref, v_ref, m_ref = refs[:4]
            out_refs = refs[4:]
        else:
            q_ref, k_ref, v_ref = refs[:3]
            m_ref = None
            out_refs = refs[3:]
        o_ref = out_refs[0]
        attn_ref = out_refs[1] if return_attn else None

        # Native-dtype operands straight to the MXU (f32 accumulation).
        q = q_ref[...]   # (Hb, TQ, D)
        k = k_ref[...]   # (Hb, Lk, D)
        v = v_ref[...]   # (Hb, Lk, D)

        # Batched, transpose-free q @ k^T: contract D of both operands.
        s = lax.dot_general(
            q, k,
            dimension_numbers=(((2,), (2,)), ((0,), (0,))),
            preferred_element_type=jnp.float32,
        )                                   # (Hb, TQ, Lk) f32
        s = s * jnp.float32(inv_temperature)

        if with_mask:
            keep = m_ref[...] != 0          # (TQ, Lk) or (Hb, TQ, Lk); broadcasts
            s = jnp.where(keep, s, jnp.float32(-1e9))

        # Numerically stable softmax over the key axis (f32).
        s_max = jnp.max(s, axis=-1, keepdims=True)
        p = jnp.exp(s - s_max)
        denom = jnp.sum(p, axis=-1, keepdims=True)

        if return_attn:
            # Exact reciprocal so the returned probabilities sum to 1.
            attn = p * pl.reciprocal(denom, approx=False)
            attn_ref[...] = attn.astype(attn_ref.dtype)
            o = lax.dot_general(
                attn.astype(v.dtype), v,
                dimension_numbers=(((2,), (1,)), ((0,), (0,))),
                preferred_element_type=jnp.float32,
            )
            o_ref[...] = o.astype(o_ref.dtype)
        else:
            # Defer normalization to the small (TQ, D) output and use the
            # approximate (EUP-slot) reciprocal — removes an Lq*Lk VPU multiply.
            o = lax.dot_general(
                p.astype(v.dtype), v,
                dimension_numbers=(((2,), (1,)), ((0,), (0,))),
                preferred_element_type=jnp.float32,
            )
            o = o * pl.reciprocal(denom, approx=True)
            o_ref[...] = o.astype(o_ref.dtype)

    return kernel


def scaled_dot_product_attention(q, k, v, temperature, mask=None, *,
                                 return_attn=True, heads_per_block=None,
                                 q_tile=None):
    """Pallas TPU implementation of ScaledDotProductAttention.forward (eval mode).

    q: [B,H,Lq,D], k/v: [B,H,Lk,D]; mask broadcastable to [B,H,Lq,Lk] (0 = masked).
    Returns (output [B,H,Lq,D], attn [B,H,Lq,Lk] or None if return_attn=False).
    """
    B, H, Lq, D = q.shape
    Lk = k.shape[2]
    assert k.shape == (B, H, Lk, D) and v.shape == (B, H, Lk, D)

    BH = B * H
    qf = q.reshape(BH, Lq, D)
    kf = k.reshape(BH, Lk, D)
    vf = v.reshape(BH, Lk, D)

    hb = heads_per_block if heads_per_block is not None else _pick_heads_per_block(BH)
    assert BH % hb == 0
    tq = q_tile if q_tile is not None else _pick_q_tile(Lq)
    assert Lq % tq == 0
    grid = (BH // hb, Lq // tq)

    q_spec = pl.BlockSpec((hb, tq, D), lambda g, t: (g, t, 0))
    kv_spec = pl.BlockSpec((hb, Lk, D), lambda g, t: (g, 0, 0))
    o_spec = pl.BlockSpec((hb, tq, D), lambda g, t: (g, t, 0))
    attn_spec = pl.BlockSpec((hb, tq, Lk), lambda g, t: (g, t, 0))

    in_arrays = [qf, kf, vf]
    in_specs = [q_spec, kv_spec, kv_spec]

    with_mask = mask is not None
    mask_bytes = 0
    if with_mask:
        m = jnp.asarray(mask)
        m4 = m.reshape((1,) * (4 - m.ndim) + m.shape)
        if m4.shape[0] == 1 and m4.shape[1] == 1:
            # Shared mask: one small (Lq, Lk) int8 block reused by every grid step.
            m_arr = jnp.broadcast_to(m4[0, 0], (Lq, Lk)).astype(jnp.int8)
            in_specs.append(pl.BlockSpec((tq, Lk), lambda g, t: (t, 0)))
        else:
            # Per-(batch/head) mask: densify only at int8 (4x less HBM than int32).
            m_arr = jnp.broadcast_to(m4, (B, H, Lq, Lk)).astype(jnp.int8)
            m_arr = m_arr.reshape(BH, Lq, Lk)
            in_specs.append(pl.BlockSpec((hb, tq, Lk), lambda g, t: (g, t, 0)))
        in_arrays.append(m_arr)
        mask_bytes = int(m_arr.size) * m_arr.dtype.itemsize

    o_shape = jax.ShapeDtypeStruct((BH, Lq, D), q.dtype)
    if return_attn:
        out_shape = (o_shape, jax.ShapeDtypeStruct((BH, Lq, Lk), q.dtype))
        out_specs = (o_spec, attn_spec)
    else:
        out_shape = o_shape
        out_specs = o_spec

    # Advisory cost estimate for XLA's scheduler.
    bpe = q.dtype.itemsize
    flops = 4 * BH * Lq * Lk * D
    transcendentals = BH * Lq * Lk
    bytes_accessed = (2 * BH * Lq * D + 2 * BH * Lk * D) * bpe + mask_bytes
    if return_attn:
        bytes_accessed += BH * Lq * Lk * bpe

    # Per-step VMEM estimate (double-buffered blocks + f32 logits intermediates);
    # raise the scoped-VMEM limit only when needed, with headroom for v7x (64 MiB).
    blk_bytes = 2 * (2 * hb * tq * D * bpe + 2 * hb * Lk * D * bpe
                     + (hb * tq * Lk * bpe if return_attn else 0)
                     + (hb * tq * Lk if with_mask else 0))
    blk_bytes += 4 * hb * tq * Lk * 4
    cp_kwargs = dict(dimension_semantics=("parallel", "parallel"))
    if blk_bytes > 32 * 1024 * 1024:
        cp_kwargs["vmem_limit_bytes"] = int(min(56 * 1024 * 1024, 2 * blk_bytes))

    kernel = _make_sdpa_kernel(float(1.0 / temperature), with_mask, return_attn)
    result = pl.pallas_call(
        kernel,
        out_shape=out_shape,
        grid_spec=pltpu.PrefetchScalarGridSpec(
            num_scalar_prefetch=0,
            grid=grid,
            in_specs=in_specs,
            out_specs=out_specs,
        ),
        compiler_params=pltpu.CompilerParams(**cp_kwargs),
        cost_estimate=pl.CostEstimate(
            flops=flops,
            transcendentals=transcendentals,
            bytes_accessed=bytes_accessed,
        ),
    )(*in_arrays)

    if return_attn:
        of, attnf = result
        return of.reshape(B, H, Lq, D), attnf.reshape(B, H, Lq, Lk)
    return result.reshape(B, H, Lq, D), None


def _reference(q, k, v, temperature, mask=None):
    qf, kf, vf = (x.astype(jnp.float32) for x in (q, k, v))
    s = jnp.einsum("bhqd,bhkd->bhqk", qf / temperature, kf)
    if mask is not None:
        s = jnp.where(mask == 0, -1e9, s)
    attn = jax.nn.softmax(s, axis=-1)
    out = jnp.einsum("bhqk,bhkd->bhqd", attn, vf)
    return out, attn


if __name__ == "__main__":
    B, H, L, D = 2, 2, 8, 32
    temperature = float(D) ** 0.5

    key = jax.random.PRNGKey(0)
    kq, kk, kv = jax.random.split(key, 3)
    q = jax.random.normal(kq, (B, H, L, D), dtype=jnp.float32)
    k = jax.random.normal(kk, (B, H, L, D), dtype=jnp.float32)
    v = jax.random.normal(kv, (B, H, L, D), dtype=jnp.float32)

    # 1) unmasked, attn returned (module forward, eval mode)
    out, attn = scaled_dot_product_attention(q, k, v, temperature)
    jax.block_until_ready((out, attn))
    out_ref, attn_ref = _reference(q, k, v, temperature)
    assert out.shape == (B, H, L, D) and attn.shape == (B, H, L, L)
    assert jnp.allclose(out, out_ref, atol=2e-5, rtol=2e-5)
    assert jnp.allclose(attn, attn_ref, atol=2e-5, rtol=2e-5)

    # 2) shared broadcastable mask -> single reused (Lq, Lk) int8 block
    causal = jnp.tril(jnp.ones((L, L), dtype=jnp.int32)).reshape(1, 1, L, L)
    out_m, attn_m = scaled_dot_product_attention(q, k, v, temperature, mask=causal)
    out_mr, attn_mr = _reference(q, k, v, temperature, mask=causal)
    assert jnp.allclose(out_m, out_mr, atol=2e-5, rtol=2e-5)
    assert jnp.allclose(attn_m, attn_mr, atol=2e-5, rtol=2e-5)

    # 3) per-batch mask -> dense int8 mask path
    mkey = jax.random.PRNGKey(1)
    bmask = (jax.random.uniform(mkey, (B, 1, L, L)) > 0.3).astype(jnp.int32)
    bmask = bmask.at[..., 0].set(1)  # keep at least one key per query row
    out_b, attn_b = scaled_dot_product_attention(q, k, v, temperature, mask=bmask)
    out_br, attn_br = _reference(q, k, v, temperature, mask=bmask)
    assert jnp.allclose(out_b, out_br, atol=2e-5, rtol=2e-5)
    assert jnp.allclose(attn_b, attn_br, atol=2e-5, rtol=2e-5)

    # 4) output-only path (no attn writeback, deferred approx normalization)
    out_o, attn_o = scaled_dot_product_attention(q, k, v, temperature,
                                                 return_attn=False)
    assert attn_o is None
    assert jnp.allclose(out_o, out_ref, atol=1e-2, rtol=1e-2)

    # 5) bf16 inputs: bf16 operands straight to the MXU, f32 accumulation
    qb, kb, vb = (x.astype(jnp.bfloat16) for x in (q, k, v))
    out_bf, attn_bf = scaled_dot_product_attention(qb, kb, vb, temperature)
    out_bfr, attn_bfr = _reference(qb, kb, vb, temperature)
    assert out_bf.dtype == jnp.bfloat16 and attn_bf.dtype == jnp.bfloat16
    assert jnp.allclose(out_bf.astype(jnp.float32), out_bfr, atol=1e-1, rtol=1e-1)
    assert jnp.allclose(attn_bf.astype(jnp.float32), attn_bfr, atol=3e-2, rtol=3e-2)

    jax.block_until_ready((out_m, out_b, out_o, out_bf))
    print("KERNEL_OK")
</pallas_src>

<mosaic_0001>
module attributes {stable_mosaic.version = 11 : i64} {
  func.func @kernel(%arg0: i32, %arg1: i32, %arg2: memref<2x8x32xf32, #tpu.memory_space<vmem>>, %arg3: memref<2x8x32xf32, #tpu.memory_space<vmem>>, %arg4: memref<2x8x32xf32, #tpu.memory_space<vmem>>, %arg5: memref<2x8x32xf32, #tpu.memory_space<vmem>>, %arg6: memref<2x8x8xf32, #tpu.memory_space<vmem>>) attributes {dimension_semantics = [#tpu.dimension_semantics<parallel>, #tpu.dimension_semantics<parallel>], iteration_bounds = array<i64: 2, 1>, scalar_prefetch = 0 : i64, scratch_operands = 0 : i64, tpu.core_type = #tpu.core_type<tc>, window_params = [{transform_indices = @transform_0, window_bounds = array<i64: 2, 8, 32>}, {transform_indices = @transform_1, window_bounds = array<i64: 2, 8, 32>}, {transform_indices = @transform_2, window_bounds = array<i64: 2, 8, 32>}, {transform_indices = @transform_3, window_bounds = array<i64: 2, 8, 32>}, {transform_indices = @transform_4, window_bounds = array<i64: 2, 8, 8>}]} {
    %c0 = arith.constant 0 : index
    %c0_0 = arith.constant 0 : index
    %c0_1 = arith.constant 0 : index
    %0 = vector.load %arg2[%c0, %c0_0, %c0_1] : memref<2x8x32xf32, #tpu.memory_space<vmem>>, vector<2x8x32xf32>
    %c0_2 = arith.constant 0 : index
    %c0_3 = arith.constant 0 : index
    %c0_4 = arith.constant 0 : index
    %1 = vector.load %arg3[%c0_2, %c0_3, %c0_4] : memref<2x8x32xf32, #tpu.memory_space<vmem>>, vector<2x8x32xf32>
    %c0_5 = arith.constant 0 : index
    %c0_6 = arith.constant 0 : index
    %c0_7 = arith.constant 0 : index
    %2 = vector.load %arg4[%c0_5, %c0_6, %c0_7] : memref<2x8x32xf32, #tpu.memory_space<vmem>>, vector<2x8x32xf32>
    %cst = arith.constant dense<0.000000e+00> : vector<2x8x8xf32>
    %3 = tpu.matmul %0, %1, %cst {dimension_numbers = #tpu.dot_dimension_numbers<[2], [2], [1], [1], [0, 0, 0, 1, 1, 1], [0], [0]>} : vector<2x8x32xf32>, vector<2x8x32xf32>, vector<2x8x8xf32> -> vector<2x8x8xf32>
    %cst_8 = arith.constant 0.176776692 : f32
    %4 = vector.broadcast %cst_8 : f32 to vector<2x8x8xf32>
    %5 = arith.mulf %3, %4 : vector<2x8x8xf32>
    %cst_9 = arith.constant dense<0xFF800000> : vector<2x8xf32>
    %6 = vector.multi_reduction <maximumf>, %5, %cst_9 [2] : vector<2x8x8xf32> to vector<2x8xf32>
    %7 = vector.shape_cast %6 : vector<2x8xf32> to vector<2x8x1xf32>
    %8 = vector.broadcast %7 : vector<2x8x1xf32> to vector<2x8x8xf32>
    %9 = arith.subf %5, %8 : vector<2x8x8xf32>
    %10 = math.exp %9 : vector<2x8x8xf32>
    %cst_10 = arith.constant dense<0.000000e+00> : vector<2x8xf32>
    %11 = vector.multi_reduction <add>, %10, %cst_10 [2] : vector<2x8x8xf32> to vector<2x8xf32>
    %12 = vector.shape_cast %11 : vector<2x8xf32> to vector<2x8x1xf32>
    %13 = tpu.reciprocal %12 : vector<2x8x1xf32> -> vector<2x8x1xf32>
    %14 = vector.broadcast %13 : vector<2x8x1xf32> to vector<2x8x8xf32>
    %15 = arith.mulf %10, %14 : vector<2x8x8xf32>
    %c0_11 = arith.constant 0 : index
    %c0_12 = arith.constant 0 : index
    %c0_13 = arith.constant 0 : index
    %16 = vector.load %arg6[%c0_11, %c0_12, %c0_13] : memref<2x8x8xf32, #tpu.memory_space<vmem>>, vector<2x8x8xf32>
    tpu.vector_store %arg6[%c0_11, %c0_12, %c0_13], %15 {strides = array<i32>} : memref<2x8x8xf32, #tpu.memory_space<vmem>>, vector<2x8x8xf32>,
    %cst_14 = arith.constant dense<0.000000e+00> : vector<2x8x32xf32>
    %17 = tpu.matmul %15, %2, %cst_14 {dimension_numbers = #tpu.dot_dimension_numbers<[2], [1], [1], [2], [0, 0, 0, 1, 1, 2], [0], [0]>} : vector<2x8x8xf32>, vector<2x8x32xf32>, vector<2x8x32xf32> -> vector<2x8x32xf32>
    %c0_15 = arith.constant 0 : index
    %c0_16 = arith.constant 0 : index
    %c0_17 = arith.constant 0 : index
    %18 = vector.load %arg5[%c0_15, %c0_16, %c0_17] : memref<2x8x32xf32, #tpu.memory_space<vmem>>, vector<2x8x32xf32>
    tpu.vector_store %arg5[%c0_15, %c0_16, %c0_17], %17 {strides = array<i32>} : memref<2x8x32xf32, #tpu.memory_space<vmem>>, vector<2x8x32xf32>,
    return
  }
  func.func @transform_0(%arg0: i32, %arg1: i32) -> (i32, i32, i32) {
    %c0_i32 = arith.constant 0 : i32
    %c0_i32_0 = arith.constant 0 : i32
    return %arg0, %arg1, %c0_i32 : i32, i32, i32
  }
  func.func @transform_1(%arg0: i32, %arg1: i32) -> (i32, i32, i32) {
    %c0_i32 = arith.constant 0 : i32
    %c0_i32_0 = arith.constant 0 : i32
    %c0_i32_1 = arith.constant 0 : i32
    return %arg0, %c0_i32, %c0_i32_0 : i32, i32, i32
  }
  func.func @transform_2(%arg0: i32, %arg1: i32) -> (i32, i32, i32) {
    %c0_i32 = arith.constant 0 : i32
    %c0_i32_0 = arith.constant 0 : i32
    %c0_i32_1 = arith.constant 0 : i32
    return %arg0, %c0_i32, %c0_i32_0 : i32, i32, i32
  }
  func.func @transform_3(%arg0: i32, %arg1: i32) -> (i32, i32, i32) {
    %c0_i32 = arith.constant 0 : i32
    %c0_i32_0 = arith.constant 0 : i32
    return %arg0, %arg1, %c0_i32 : i32, i32, i32
  }
  func.func @transform_4(%arg0: i32, %arg1: i32) -> (i32, i32, i32) {
    %c0_i32 = arith.constant 0 : i32
    %c0_i32_0 = arith.constant 0 : i32
    return %arg0, %arg1, %c0_i32 : i32, i32, i32
  }
}

</mosaic_0001>

<bundles_post_ra>
// kernel: tpu_custom_call.1
= control target key start
LH: loop header
LB: loop body
LE: loop exit
PB: predicated region body
PF: predicated region fallthrough
CT: control target
= control target key end

     0   :  { %s1261_s0 = inlined_call_operand.hbm [shape: f32[4,8,32], index: 0, kind: input, shape index: {}]   ;;  %s1262_s1 = inlined_call_operand.hbm [shape: f32[4,8,32], index: 1, kind: input, shape index: {}]   ;;  %s1263_s2 = inlined_call_operand.hbm [shape: f32[4,8,32], index: 2, kind: input, shape index: {}]   ;;  %s1264_s3 = inlined_call_operand.hbm [shape: f32[4,8,32], index: 3, kind: output, shape index: {0}]   ;;  %s1265_s4 = inlined_call_operand.hbm [shape: f32[4,8,8], index: 4, kind: output, shape index: {1}]  }
   0x1   :  { %1272 = sst [smem:[#allocation21_spill]] %s1262_s1 }
   0x2   :  { %10 = vsyncpa [#allocation3], 0 }
   0x3   :  { %12 = vsyncpa [#allocation3 + $0x1], 0 }
   0x4   :  { %13 = vsyncpa [#allocation6], 0 }
   0x5   :  { %15 = vsyncpa [#allocation6 + $0x1], 0 }
   0x6   :  { %16 = vsyncpa [#allocation4], 0 }
   0x7   :  { %18 = vsyncpa [#allocation4 + $0x1], 0 }
   0x8   :  { %19 = vsyncpa [#allocation10], 0 }
   0x9   :  { %21 = vsyncpa [#allocation10 + $0x1], 0  ;;  %s1063_s15 = smov 0   ;;  %s1065_s16 = smov 0  }
   0xa   :  { %s1067_s17 = smov 0   ;;  %s1069_s18 = smov 0  }
   0xb   :  { %s1071_s19 = smov 0   ;;  %s1073_s20 = smov 0  }
   0xc LB: > { %1273 = sst [smem:[#allocation15_spill]] %s1020_s17  ;;  %s1094_s21 = sadd.s32 4294967295, %s1032_s20   ;;  %s1032_s20 = sphi %s1073_s20, %s27_s20   ;;  %s1028_s19 = sphi %s1071_s19, %s1291_s19   ;;  %s1024_s18 = sphi %s1069_s18, %s1290_s18   ;;  %s1020_s17 = sphi %s1067_s17, %s1289_s17   ;;  %s1016_s16 = sphi %s1065_s16, %s1293_s16   ;;  %s1012_s15 = sphi %s1063_s15, %s1292_s15  }
   0xd   : > { %1274 = sst [smem:[#allocation16_spill]] %s1028_s19  ;;  %s698_s22 = sadd.s32 4294967294, %s1032_s20  }
   0xe   : > { %1275 = sst [smem:[#allocation17_spill]] %s1032_s20  ;;  %s39_s23 = sadd.s32 1, %s1028_s19 }
   0xf   : > { %s48_s24 = sadd.s32 1, %s1020_s17  ;;  %p41_p0 = scmp.ge.s32.totalorder %s39_s23, 2 }
  0x10   : > { %p55_p1 = scmp.ne.s32.totalorder %s1020_s17, %s1016_s16  ;;  %p56_p2 = scmp.eq.s32.totalorder %s1032_s20, 0 }
  0x11   : > { %p61_p3 = scmp.ne.s32.totalorder %s1016_s16, %s1012_s15  ;;  %s1295_s23 = smov (%p41_p0, %s39_s23), 0 }
  0x12   : > { %1276 = sst [smem:[#allocation18_spill]] %s1295_s23  ;;  %p1106_p4 = por %p56_p2, %p55_p1 }
  0x13   : > { %p62_p5 = scmp.eq.s32.totalorder %s1094_s21, 0  ;;  %s43_s26 = ssub.s32 %s1028_s19, %s1295_s23 }
  0x14   : > { %p139_p6 = scmp.eq.s32.totalorder %s1094_s21, 1  ;;  %p46_p7 = scmp.eq.s32.totalorder %s43_s26, 0 }
  0x15   : > { %p1114_p8 = por %p62_p5, %p61_p3  ;;  %p145_p10 = scmp.eq.s32.totalorder %s698_s22, 1 }
  0x16   : > { %p1118_p9 = por %p139_p6, %p55_p1  ;;  %p700_p12 = scmp.ge.s32.totalorder %s1032_s20, 2 }
  0x17   : > { %s1123_s29 = scalar_select %p46_p7, %s1020_s17, %s48_s24  }
  0x18   : > { %p1125_p11 = por %p145_p10, %p61_p3  ;;  %p762_p13 = scmp.lt.s32.totalorder %s1032_s20, 2 }
  0x19   : > { %1280 = sst [smem:[#allocation19_spill]] %s1123_s29  ;;  %s193_s5 = sand.u32 1, %s1020_s17  }
  0x1a   : > { %s1281_s30 = scalar_select %p1125_p11, 1, 0 }
  0x1b   : > { %s1132_s6 = sshll.u32 %s193_s5, 4  ;;  %s730_s7 = sshll.u32 %s1028_s19, 4 }
  0x1c   : > { %1282 = sst [smem:[#allocation20_spill]] %s1281_s30  ;;  %p1137_p0 = pnand %p762_p13, %p1106_p4 }
  0x1d   : > { %s216_s9 = sand.u32 1, %s1032_s20   ;;  %s1284_s1 = sld [smem:[#allocation21_spill]] }
  0x1e   : > { %s220_s14 = scalar_lea.vmem [#allocation5], %s1132_s6  ;;  %s217_s24 = scalar_lea.sflag [#allocation6], %s216_s9 }
  0x1f   : > { %s228_s22 = sshll.u32 %s220_s14, 4  ;;  %s1034_s26 = smov 128   ;;  %s229_s22 = int_to_ptr.vmem [resolvable:$true] %s228_s22 }
  0x20   : > { %s1035_s25 = smov 8   ;;  %p710_p1 = scmp.ge.s32.totalorder %s1032_s20, 1 }
  0x21   : > { %p258_p2 = scmp.lt.s32.totalorder %s1032_s20, 3  ;;  %s194_s9 = scalar_lea.sflag [#allocation3], %s193_s5 }
  0x22   : > { %s247_s29 = scalar_lea.hbm %s1263_s2, %s730_s7  ;;  %s242_s20 = scalar_lea.vmem [#allocation7], %s1132_s6 }
  0x23   : > { %s225_s12 = scalar_lea.hbm %s1284_s1, %s730_s7  ;;  %p1150_p3 = pnand %p710_p1, %p258_p2 }
  0x24   : > { %s226_s13 = sshll.u32 %s225_s12, 4  ;;  %s203_s12 = scalar_lea.hbm %s1261_s0, %s730_s7  ;;  %s227_s13 = int_to_ptr.hbm [resolvable:$true] %s226_s13 }
  0x25   : > { %751 = dma.hbm_to_vmem [thread:$0]  (!%p1137_p0), %s227_s13, 256, %s229_s22, %s217_s24, %s1034_s26, %s1034_s26, %s1035_s25  }
  0x26   : > { %s204_s14 = sshll.u32 %s203_s12, 4  ;;  %s197_s1 = scalar_lea.vmem [#allocation2], %s1132_s6  ;;  %s205_s14 = int_to_ptr.hbm [resolvable:$true] %s204_s14 }
  0x27   : > { %s206_s19 = sshll.u32 %s197_s1, 4  ;;  %s248_s17 = sshll.u32 %s247_s29, 4  ;;  %s207_s19 = int_to_ptr.vmem [resolvable:$true] %s206_s19  ;;  %s249_s17 = int_to_ptr.hbm [resolvable:$true] %s248_s17 }
  0x28   : > { %748 = dma.hbm_to_vmem [thread:$0]  (!%p1137_p0), %s205_s14, 256, %s207_s19, %s194_s9, %s1034_s26, %s1034_s26, %s1035_s25  }
  0x29   : > { %s250_s30 = sshll.u32 %s242_s20, 4  ;;  %262 = sbr.rel (%p1150_p3) target bundleno = 589 (0x24d), region = 32  ;;  %s251_s30 = int_to_ptr.vmem [resolvable:$true] %s250_s30 }
  0x2a   : > { %754 = dma.hbm_to_vmem [thread:$0]  (!%p1137_p0), %s249_s17, 256, %s251_s30, %s217_s24, %s1034_s26, %s1034_s26, %s1035_s25  }
  0x2b   : > { %s1169_s1 = sand.u32 (!%p1150_p3), 1, %s1016_s16  }
  0x2c   : > { %s1172_s19 = sshll.u32 (!%p1150_p3), %s1169_s1, 4  ;;  %s265_s5 = scalar_lea.sflag (!%p1150_p3), [#allocation3], %s1169_s1 }
  0x2d   : > { %s268_s29 = scalar_lea.vmem (!%p1150_p3), [#allocation2], %s1172_s19 }
  0x2e   : > { %995 = dma.done.wait (%p1114_p8), %s265_s5, 256  }
  0x2f   : > { %997 = vsyncadd (%p1114_p8), %s265_s5, 4294967040  ;;  %s274_s17 = sand.u32 1, %s1094_s21   ;;  %s278_s23 = scalar_lea.vmem [#allocation5], %s1172_s19 }
  0x30   : > { %s275_s20 = scalar_lea.sflag [#allocation6], %s274_s17 }
  0x31   : > { %999 = dma.done.wait (%p1114_p8), %s275_s20, 512  }
  0x32   : > { %1001 = vsyncadd (%p1114_p8), %s275_s20, 4294966784  ;;  %vm340_vm0 = vcmask 261120   ;;  %v336_v0 = vld [vmem:[%s278_s23] sm:$0xff]  ;;  %v337_v1 = vld [vmem:[%s278_s23 + $0x8] sm:$0xff]  ;;  %vm395_vm1 = vcmask 64512   ;;  %s288_s21 = scalar_lea.vmem [#allocation7], %s1172_s19 }
  0x33   : > { %716 = vmatpush.xpose.msk.msra.mxu0 %vm340_vm0, %v336_v0  ;;  %v334_v2 = vld [vmem:[%s268_s29] sm:$0xff]  ;;  %718 = vmatpush.xpose.msk.msra.mxu1 %vm340_vm0, %v337_v1  ;;  %v335_v3 = vld [vmem:[%s268_s29 + $0x8] sm:$0xff]  ;;  %s328_s27 = scalar_lea.vmem [#allocation9], %s1172_s19  ;;  %s733_s30 = sshll.u32 %s1024_s18, 4 }
  0x34   : > { %v338_v20 = vld [vmem:[%s288_s21] sm:$0xff]  ;;  %v339_v21 = vld [vmem:[%s288_s21 + $0x8] sm:$0xff]  ;;  %s531_s6 = sshll.u32 %s328_s27, 4  ;;  %s530_s24 = scalar_lea.hbm %s1265_s4, %s733_s30  ;;  %s532_s6 = int_to_ptr.vmem [resolvable:$true] %s531_s6 }
  0x35   : > { %464 = vmatpush.msra.mxu2 %v338_v20  ;;  %487 = vmatpush.msra.mxu3 %v339_v21  ;;  %s533_s26 = sshll.u32 %s530_s24, 4  ;;  %s500_s25 = scalar_lea.sflag [#allocation10], %s1169_s1  ;;  %s534_s26 = int_to_ptr.hbm [resolvable:$true] %s533_s26 }
  0x36   : > { %717 = vmatmul.msk.f32.vlgmr.msra.gmra.mxu0 %vm340_vm0, %v334_v2  ;;  %719 = vmatmul.msk.f32.vlgmr.msra.gmra.mxu1 %vm340_vm0, %v335_v3  ;;  %s928_s10 = sshra.s32 %s534_s26, 4  ;;  %s934_s18 = scalar_lea.hbm %s1265_s4, 32  ;;  %s929_s10 = int_to_ptr.hbm [resolvable:$true] %s928_s10 }
  0x37   : > { %s930_s11 = scalar_lea.hbm %s929_s10, 16  ;;  %p935_p7 = scmp.lt.s32.totalorder %s929_s10, %s1265_s4 }
  0x38   : > { %p931_p4 = scmp.ne.s32.totalorder %s929_s10, %s930_s11  ;;  %p936_p8 = scmp.lt.s32.totalorder %s934_s18, %s930_s11 }
  0x3a   : > { %p932_p5 = pnand %p931_p4, %p1118_p9  ;;  %p937_p10 = por %p936_p8, %p935_p7 }
  0x3c   : > { %p933_p6 = pneg %p932_p5 }
  0x3e   : > { %p938_p13 = pnand %p937_p10, %p933_p6 }
  0xb3   : > { %v364_v4 = vpop.f32.mrf.mxu0  ;;  %v390_v6 = vpop.f32.mrf.mxu1 }
  0xb4   : > { %v393_v5 = vmul.f32 0.17677669, %v364_v4  ;;  %v394_v8 = vmul.f32 0.17677669, %v390_v6 }
  0xb6   : > { %v396_v7 = vsel %vm395_vm1, %v393_v5, -inf  ;;  %v399_v9 = vsel %vm395_vm1, %v394_v8, -inf }
  0xb7   : > { %397 = vmax.xlane.f32.xlu0 %v396_v7 }
  0xbf   : > { %400 = vmax.xlane.f32.xlu0 %v399_v9 }
 0x12a   : > { %v398_v10 = vpop.xlane.xlu0 %397 }
 0x12b   : > { %v402_v11 = vsub.f32 %v393_v5, %v398_v10 }
 0x12d   : > { %v404_v12 = vmul.f32 1.442695, %v402_v11 }
 0x12f   : > { %816 = vpow2.f32 %v404_v12 }
 0x132   : > { %v401_v13 = vpop.xlane.xlu0 %400 }
 0x133   : > { %v403_v14 = vsub.f32 %v394_v8, %v401_v13 }
 0x135   : > { %v817_v15 = vpop.eup %816  ;;  %v406_v16 = vmul.f32 1.442695, %v403_v14 }
 0x136   : > { %v408_v17 = vsel %vm395_vm1, %v817_v15, 0.0 }
 0x137   : > { %818 = vpow2.f32 %v406_v16  ;;  %409 = vadd.xlane.f32.xlu1 %v408_v17 }
 0x13d   : > { %v819_v18 = vpop.eup %818 }
 0x13e   : > { %v411_v19 = vsel %vm395_vm1, %v819_v18, 0.0 }
 0x13f   : > { %412 = vadd.xlane.f32.xlu1 %v411_v19 }
 0x1aa   : > { %v410_v22 = vpop.xlane.xlu1 %409 }
 0x1ab   : > { %820 = vrcp.f32 %v410_v22  ;;  %v425_v27 = vand.u32 2147483648, %v410_v22  ;;  %v423_v29 = vand.u32 2147483647, %v410_v22  ;;  %vm419_vm3 = vweird.f32 %v410_v22 }
 0x1ad   : > { %v426_v32 = vor.u32 1.1754944e-38, %v425_v27  ;;  %vm424_vm5 = vcmp.eq.f32.partialorder %v423_v29, 8.507059e+37 }
 0x1b1   : > { %v821_v23 = vpop.eup %820 }
 0x1b2   : > { %v415_v24 = vmul.f32 %v821_v23, %v410_v22  ;;  %v413_v25 = vpop.xlane.xlu1 %412  ;;  %vm420_vm2 = vweird.f32 %v821_v23 }
 0x1b3   : > { %822 = vrcp.f32 %v413_v25  ;;  %vm421_vm4 = vmor %vm419_vm3, %vm420_vm2  ;;  %v439_v38 = vand.u32 2147483648, %v413_v25  ;;  %v437_v40 = vand.u32 2147483647, %v413_v25  ;;  %vm433_vm7 = vweird.f32 %v413_v25 }
 0x1b4   : > { %v416_v26 = vsub.f32 1.0, %v415_v24 }
 0x1b5   : > { %v440_v42 = vor.u32 1.1754944e-38, %v439_v38  ;;  %vm438_vm9 = vcmp.eq.f32.partialorder %v437_v40, 8.507059e+37 }
 0x1b6   : > { %v417_v28 = vmul.f32 %v821_v23, %v416_v26 }
 0x1b8   : > { %v418_v30 = vadd.f32 %v821_v23, %v417_v28 }
 0x1b9   : > { %v823_v31 = vpop.eup %822 }
 0x1ba   : > { %v429_v33 = vmul.f32 %v823_v31, %v413_v25  ;;  %v422_v34 = vsel %vm421_vm4, %v821_v23, %v418_v30  ;;  %vm434_vm6 = vweird.f32 %v823_v31 }
 0x1bb   : > { %v427_v35 = vsel %vm424_vm5, %v426_v32, %v422_v34  ;;  %vm435_vm8 = vmor %vm433_vm7, %vm434_vm6 }
 0x1bc   : > { %v430_v36 = vsub.f32 1.0, %v429_v33  ;;  %v442_v37 = vmul.f32 %v817_v15, %v427_v35 }
 0x1be   : > { %v431_v39 = vmul.f32 %v823_v31, %v430_v36  ;;  %444 = vst.msk [vmem:[%s328_s27] sm:$0xff] %vm395_vm1, %v442_v37  ;;  %720 = vmatmul.msk.f32.vlgmr.msra.gmra.mxu2 %vm395_vm1, %v442_v37 }
 0x1c0   : > { %v432_v41 = vadd.f32 %v823_v31, %v431_v39 }
 0x1c2   : > { %v436_v43 = vsel %vm435_vm8, %v823_v31, %v432_v41 }
 0x1c3   : > { %v441_v44 = vsel %vm438_vm9, %v440_v42, %v436_v43 }
 0x1c4   : > { %v443_v45 = vmul.f32 %v819_v18, %v441_v44 }
 0x1c6   : > { %445 = vst.msk [vmem:[%s328_s27 + $0x8] sm:$0xff] %vm395_vm1, %v443_v45  ;;  %721 = vmatmul.msk.f32.vlgmr.msra.gmra.mxu3 %vm395_vm1, %v443_v45 }
 0x1c7   : > { %941 = shalt.err (!%p938_p13)
}
 0x1c8   : > { %s1036_s22 = smov 128   ;;  %s1037_s5 = smov 8  }
 0x1c9   : > { %742 = dma.vmem_to_hbm [thread:$0]  (%p1118_p9), %s532_s6, 256, %s534_s26, %s500_s25, %s1036_s22, %s1036_s22, %s1037_s5  }
 0x1ca   : > { %s321_s29 = scalar_lea.vmem [#allocation8], %s1172_s19  ;;  %s512_s23 = scalar_lea.hbm %s1264_s3, %s733_s30 }
 0x1cb   : > { %s513_s21 = sshll.u32 %s321_s29, 4  ;;  %s515_s27 = sshll.u32 %s512_s23, 4  ;;  %s514_s21 = int_to_ptr.vmem [resolvable:$true] %s513_s21  ;;  %s516_s27 = int_to_ptr.hbm [resolvable:$true] %s515_s27 }
 0x1cc   : > { %s495_s7 = scalar_lea.sflag [#allocation4], %s1169_s1  ;;  %s956_s8 = sshra.s32 %s516_s27, 4  ;;  %s957_s8 = int_to_ptr.hbm [resolvable:$true] %s956_s8 }
 0x1cd   : > { %s958_s6 = scalar_lea.hbm %s957_s8, 16  ;;  %s962_s26 = scalar_lea.hbm %s1264_s3, 32 }
 0x1ce   : > { %p959_p0 = scmp.ne.s32.totalorder %s957_s8, %s958_s6  ;;  %p963_p3 = scmp.lt.s32.totalorder %s957_s8, %s1264_s3 }
 0x1cf   : > { %p964_p4 = scmp.lt.s32.totalorder %s962_s26, %s958_s6 }
 0x1d0   : > { %p960_p1 = pnand %p959_p0, %p1118_p9 }
 0x1d1   : > { %p965_p5 = por %p964_p4, %p963_p3 }
 0x1d2   : > { %p961_p2 = pneg %p960_p1 }
 0x1d4   : > { %p966_p6 = pnand %p965_p5, %p961_p2 }
 0x241   : > { %v466_v46 = vpop.f32.mrf.mxu2 }
 0x242   : > { %492 = vst.msk [vmem:[%s321_s29] sm:$0xff] %vm340_vm0, %v466_v46 }
 0x249   : > { %v489_v47 = vpop.f32.mrf.mxu3 }
 0x24a   : > { %493 = vst.msk [vmem:[%s321_s29 + $0x8] sm:$0xff] %vm340_vm0, %v489_v47 }
 0x24b   : > { %969 = shalt.err (!%p966_p6)
}
 0x24c   : > { %741 = dma.vmem_to_hbm [thread:$0]  (%p1118_p9), %s514_s21, 256, %s516_s27, %s495_s7, %s1036_s22, %s1036_s22, %s1037_s5  }
 0x24d PF: > { %s1287_s10 = sld [smem:[#allocation17_spill]]  ;;  %s548_s11 = sand.u32 1, %s1012_s15  }
 0x24e   : > { %p756_p7 = pnand %p700_p12, %p1125_p11  ;;  %s549_s12 = scalar_lea.sflag [#allocation4], %s548_s11 }
 0x250   : > { %p757_p8 = pneg %p756_p7 }
 0x252   : > { %1003 = dma.done.wait (%p757_p8), %s549_s12, 256  }
 0x253   : > { %1005 = vsyncadd (%p757_p8), %s549_s12, 4294967040  ;;  %s559_s14 = scalar_lea.sflag [#allocation10], %s548_s11 }
 0x254   : > { %1007 = dma.done.wait (%p757_p8), %s559_s14, 256  }
 0x255   : > { %1009 = vsyncadd (%p757_p8), %s559_s14, 4294967040  ;;  %s27_s20 = sadd.s32 1, %s1287_s10   ;;  %s1288_s28 = sld [smem:[#allocation15_spill]] }
 0x256   : > { %p24_p10 = scmp.ge.s32.totalorder %s27_s20, 4   ;;  %s1289_s17 = sld [smem:[#allocation19_spill]] }
 0x257   : > { %s1290_s18 = sld [smem:[#allocation16_spill]]  ;;  %s1292_s15 = smov %s1016_s16 }
 0x258   : > { %s1291_s19 = sld [smem:[#allocation18_spill]]  ;;  %26 = sbr.rel (!%p24_p10) target bundleno = 12 (0xc), region = 118 }
 0x25b   : > { %s1293_s16 = smov %s1288_s28 }
 0x25d   :  { %565 = vsyncpa [#allocation3], 1 }
 0x25e   :  { %567 = vsyncpa [#allocation3 + $0x1], 1 }
 0x25f   :  { %568 = vsyncpa [#allocation6], 1 }
 0x260   :  { %570 = vsyncpa [#allocation6 + $0x1], 1 }
 0x261   :  { %571 = vsyncpa [#allocation4], 1 }
 0x262   :  { %573 = vsyncpa [#allocation4 + $0x1], 1 }
 0x263   :  { %574 = vsyncpa [#allocation10], 1 }
 0x264   :  { %576 = vsyncpa [#allocation10 + $0x1], 1 }

</bundles_post_ra>
